<compile_context>
chip_gen: v6e
topology: v6e:2x2x1
jax: 0.10.0
libtpu: 0.0.40
codegen_flags: <defaults>
</compile_context>

<pallas_src>
import functools

import jax
import jax.numpy as jnp
from jax.experimental import pallas as pl
from jax.experimental.pallas import tpu as pltpu


def _round_up(x: int, m: int) -> int:
    return ((x + m - 1) // m) * m


def qvalue_kernel(x_ref, w1_ref, b1_ref, w2_ref, b2_ref, o_ref):
    # fc1: (TB, Sp) @ (Sp, Hp) with f32 accumulation on the MXU.
    h = jnp.dot(x_ref[...], w1_ref[...], preferred_element_type=jnp.float32)
    # Bias + ReLU in f32 (MXU already accumulates in f32; keeps v5e VPU happy).
    h = jnp.maximum(h + b1_ref[...], 0.0)
    # fc2: cast the activation to the weight dtype (no-op for f32, bf16 path
    # keeps the second matmul on the fast MXU mode), accumulate in f32.
    q = jnp.dot(h.astype(w2_ref.dtype), w2_ref[...],
                preferred_element_type=jnp.float32)
    o_ref[...] = (q + b2_ref[...]).astype(o_ref.dtype)


@functools.partial(jax.jit, static_argnames=("block_b", "compute_dtype"))
def qvalue_net(x, w1, b1, w2, b2, *, block_b: int = 512, compute_dtype=None):
    """Forward pass of QValueNet.

    x  : (B, state_dim)
    w1 : (state_dim, hidden_dim)   (transposed vs torch.nn.Linear storage)
    b1 : (hidden_dim,) or (1, hidden_dim)
    w2 : (hidden_dim, action_dim)
    b2 : (action_dim,) or (1, action_dim)
    """
    out_dtype = x.dtype
    B, S = x.shape
    H = w1.shape[1]
    A = w2.shape[1]

    # Lane-dense padding (last dims -> multiples of 128). Zero padding is
    # exact: padded hidden units see 0 input + 0 bias -> relu(0)=0 -> 0
    # contribution; padded output columns are sliced off below.
    Sp = _round_up(S, 128)
    Hp = _round_up(H, 128)
    Ap = _round_up(A, 128)

    # Batch tile: multiple of 16 sublanes (covers bf16 packing too), capped so
    # the double-buffered x/out tiles stay far below the v7x scoped-VMEM limit.
    Bp = _round_up(B, 16)
    TB = min(_round_up(block_b, 16), Bp)
    Bp = _round_up(Bp, TB)

    xp = jnp.pad(x, ((0, Bp - B), (0, Sp - S)))
    w1p = jnp.pad(w1, ((0, Sp - S), (0, Hp - H)))
    w2p = jnp.pad(w2, ((0, Hp - H), (0, Ap - A)))
    b1p = jnp.pad(b1.reshape(1, H).astype(jnp.float32), ((0, 0), (0, Hp - H)))
    b2p = jnp.pad(b2.reshape(1, A).astype(jnp.float32), ((0, 0), (0, Ap - A)))

    if compute_dtype is not None:
        # bf16 storage: halves DMA bytes + faster MXU; accumulation stays f32.
        xp = xp.astype(compute_dtype)
        w1p = w1p.astype(compute_dtype)
        w2p = w2p.astype(compute_dtype)

    grid = (Bp // TB,)
    out = pl.pallas_call(
        qvalue_kernel,
        out_shape=jax.ShapeDtypeStruct((Bp, Ap), out_dtype),
        grid_spec=pl.GridSpec(
            grid=grid,
            in_specs=[
                pl.BlockSpec((TB, Sp), lambda i: (i, 0)),   # x: tiled over batch
                pl.BlockSpec((Sp, Hp), lambda i: (0, 0)),   # w1: VMEM-resident
                pl.BlockSpec((1, Hp), lambda i: (0, 0)),    # b1
                pl.BlockSpec((Hp, Ap), lambda i: (0, 0)),   # w2
                pl.BlockSpec((1, Ap), lambda i: (0, 0)),    # b2
            ],
            out_specs=pl.BlockSpec((TB, Ap), lambda i: (i, 0)),
        ),
        compiler_params=pltpu.CompilerParams(
            # No reduction axis (S, H fit in one MXU pass): batch axis is
            # purely parallel -> pipelining + v7x dual-TC sharding.
            dimension_semantics=("parallel",),
        ),
    )(xp, w1p, b1p, w2p, b2p)
    return out[:B, :A]


def init_params(key, state_dim, hidden_dim, action_dim, dtype=jnp.float32):
    """torch.nn.Linear-style uniform(-1/sqrt(fan_in), 1/sqrt(fan_in)) init.
    Weights stored as (in_features, out_features)."""
    k1, k2, k3, k4 = jax.random.split(key, 4)
    bound1 = 1.0 / jnp.sqrt(state_dim)
    bound2 = 1.0 / jnp.sqrt(hidden_dim)
    w1 = jax.random.uniform(k1, (state_dim, hidden_dim), dtype, -bound1, bound1)
    b1 = jax.random.uniform(k2, (hidden_dim,), dtype, -bound1, bound1)
    w2 = jax.random.uniform(k3, (hidden_dim, action_dim), dtype, -bound2, bound2)
    b2 = jax.random.uniform(k4, (action_dim,), dtype, -bound2, bound2)
    return w1, b1, w2, b2


if __name__ == "__main__":
    state_dim, hidden_dim, action_dim = 16, 32, 4
    batch = 8

    key = jax.random.PRNGKey(0)
    kx, kp = jax.random.split(key)
    x = jax.random.normal(kx, (batch, state_dim), jnp.float32)
    w1, b1, w2, b2 = init_params(kp, state_dim, hidden_dim, action_dim)

    # Reference in plain JAX.
    ref = jnp.maximum(x @ w1 + b1[None, :], 0.0) @ w2 + b2[None, :]

    # f32 path (strict check).
    out = qvalue_net(x, w1, b1, w2, b2)
    out = jax.block_until_ready(out)
    assert out.shape == (batch, action_dim)
    assert jnp.allclose(out, ref, atol=1e-5, rtol=1e-5)

    # bf16-storage path (DMA/MXU optimization) — loose tolerance.
    out_bf16 = qvalue_net(x, w1, b1, w2, b2, compute_dtype=jnp.bfloat16)
    out_bf16 = jax.block_until_ready(out_bf16)
    assert out_bf16.shape == (batch, action_dim)
    assert jnp.allclose(out_bf16, ref, atol=1e-1, rtol=1e-1)

    print("KERNEL_OK")
</pallas_src>

<mosaic_0001>
module attributes {stable_mosaic.version = 11 : i64} {
  func.func @qvalue_kernel(%arg0: i32, %arg1: memref<16x128xf32, #tpu.memory_space<vmem>>, %arg2: memref<128x128xf32, #tpu.memory_space<vmem>>, %arg3: memref<1x128xf32, #tpu.memory_space<vmem>>, %arg4: memref<128x128xf32, #tpu.memory_space<vmem>>, %arg5: memref<1x128xf32, #tpu.memory_space<vmem>>, %arg6: memref<16x128xf32, #tpu.memory_space<vmem>>) attributes {dimension_semantics = [#tpu.dimension_semantics<parallel>], iteration_bounds = array<i64: 1>, scalar_prefetch = 0 : i64, scratch_operands = 0 : i64, tpu.core_type = #tpu.core_type<tc>, window_params = [{transform_indices = @transform_0, window_bounds = array<i64: 16, 128>}, {pipeline_mode = #tpu.pipeline_mode<synchronous>, transform_indices = @transform_1, window_bounds = array<i64: 128, 128>}, {pipeline_mode = #tpu.pipeline_mode<synchronous>, transform_indices = @transform_2, window_bounds = array<i64: 1, 128>}, {pipeline_mode = #tpu.pipeline_mode<synchronous>, transform_indices = @transform_3, window_bounds = array<i64: 128, 128>}, {pipeline_mode = #tpu.pipeline_mode<synchronous>, transform_indices = @transform_4, window_bounds = array<i64: 1, 128>}, {transform_indices = @transform_5, window_bounds = array<i64: 16, 128>}]} {
    %c0 = arith.constant 0 : index
    %c0_0 = arith.constant 0 : index
    %0 = vector.load %arg1[%c0, %c0_0] : memref<16x128xf32, #tpu.memory_space<vmem>>, vector<16x128xf32>
    %c0_1 = arith.constant 0 : index
    %c0_2 = arith.constant 0 : index
    %1 = vector.load %arg2[%c0_1, %c0_2] : memref<128x128xf32, #tpu.memory_space<vmem>>, vector<128x128xf32>
    %cst = arith.constant dense<0.000000e+00> : vector<16x128xf32>
    %2 = tpu.matmul %0, %1, %cst {dimension_numbers = #tpu.dot_dimension_numbers<[1], [0], [0], [1], [0, 0, 1, 1], [], []>} : vector<16x128xf32>, vector<128x128xf32>, vector<16x128xf32> -> vector<16x128xf32>
    %c0_3 = arith.constant 0 : index
    %c0_4 = arith.constant 0 : index
    %3 = vector.load %arg3[%c0_3, %c0_4] : memref<1x128xf32, #tpu.memory_space<vmem>>, vector<1x128xf32>
    %4 = vector.broadcast %3 : vector<1x128xf32> to vector<16x128xf32>
    %5 = arith.addf %2, %4 : vector<16x128xf32>
    %cst_5 = arith.constant 0.000000e+00 : f32
    %6 = vector.broadcast %cst_5 : f32 to vector<16x128xf32>
    %7 = arith.maximumf %5, %6 : vector<16x128xf32>
    %c0_6 = arith.constant 0 : index
    %c0_7 = arith.constant 0 : index
    %8 = vector.load %arg4[%c0_6, %c0_7] : memref<128x128xf32, #tpu.memory_space<vmem>>, vector<128x128xf32>
    %cst_8 = arith.constant dense<0.000000e+00> : vector<16x128xf32>
    %9 = tpu.matmul %7, %8, %cst_8 {dimension_numbers = #tpu.dot_dimension_numbers<[1], [0], [0], [1], [0, 0, 1, 1], [], []>} : vector<16x128xf32>, vector<128x128xf32>, vector<16x128xf32> -> vector<16x128xf32>
    %c0_9 = arith.constant 0 : index
    %c0_10 = arith.constant 0 : index
    %10 = vector.load %arg5[%c0_9, %c0_10] : memref<1x128xf32, #tpu.memory_space<vmem>>, vector<1x128xf32>
    %11 = vector.broadcast %10 : vector<1x128xf32> to vector<16x128xf32>
    %12 = arith.addf %9, %11 : vector<16x128xf32>
    %c0_11 = arith.constant 0 : index
    %c0_12 = arith.constant 0 : index
    %13 = vector.load %arg6[%c0_11, %c0_12] : memref<16x128xf32, #tpu.memory_space<vmem>>, vector<16x128xf32>
    tpu.vector_store %arg6[%c0_11, %c0_12], %12 {strides = array<i32>} : memref<16x128xf32, #tpu.memory_space<vmem>>, vector<16x128xf32>,
    return
  }
  func.func @transform_0(%arg0: i32) -> (i32, i32) {
    %c0_i32 = arith.constant 0 : i32
    %c0_i32_0 = arith.constant 0 : i32
    return %arg0, %c0_i32 : i32, i32
  }
  func.func @transform_1(%arg0: i32) -> (i32, i32) {
    %c0_i32 = arith.constant 0 : i32
    %c0_i32_0 = arith.constant 0 : i32
    %c0_i32_1 = arith.constant 0 : i32
    return %c0_i32, %c0_i32_0 : i32, i32
  }
  func.func @transform_2(%arg0: i32) -> (i32, i32) {
    %c0_i32 = arith.constant 0 : i32
    %c0_i32_0 = arith.constant 0 : i32
    %c0_i32_1 = arith.constant 0 : i32
    return %c0_i32, %c0_i32_0 : i32, i32
  }
  func.func @transform_3(%arg0: i32) -> (i32, i32) {
    %c0_i32 = arith.constant 0 : i32
    %c0_i32_0 = arith.constant 0 : i32
    %c0_i32_1 = arith.constant 0 : i32
    return %c0_i32, %c0_i32_0 : i32, i32
  }
  func.func @transform_4(%arg0: i32) -> (i32, i32) {
    %c0_i32 = arith.constant 0 : i32
    %c0_i32_0 = arith.constant 0 : i32
    %c0_i32_1 = arith.constant 0 : i32
    return %c0_i32, %c0_i32_0 : i32, i32
  }
  func.func @transform_5(%arg0: i32) -> (i32, i32) {
    %c0_i32 = arith.constant 0 : i32
    %c0_i32_0 = arith.constant 0 : i32
    return %arg0, %c0_i32 : i32, i32
  }
}

</mosaic_0001>

<bundles_post_ra>
// kernel: qvalue_net.1
= control target key start
LH: loop header
LB: loop body
LE: loop exit
PB: predicated region body
PF: predicated region fallthrough
CT: control target
= control target key end

     0   :  { %s478_s1 = inlined_call_operand.vmem [shape: f32[128,128], index: 1, kind: input, shape index: {}]   ;;  %s479_s0 = inlined_call_operand.vmem [shape: f32[16,128], index: 0, kind: input, shape index: {}]   ;;  %s480_s3 = inlined_call_operand.vmem [shape: f32[128,128], index: 3, kind: input, shape index: {}]   ;;  %s481_s2 = inlined_call_operand.vmem [shape: f32[1,128], index: 2, kind: input, shape index: {}]   ;;  %s482_s4 = inlined_call_operand.vmem [shape: f32[1,128], index: 4, kind: input, shape index: {}]   ;;  %s483_s5 = inlined_call_operand.vmem [shape: f32[16,128], index: 5, kind: output, shape index: {}]  }
   0x1   :  { %v37_v0 = vld [vmem:[%s478_s1 + $0x78] sm:$0xff]  ;;  %v36_v1 = vld [vmem:[%s478_s1 + $0x70] sm:$0xff]  ;;  %v35_v2 = vld [vmem:[%s478_s1 + $0x68] sm:$0xff] }
   0x2   :  { %264 = vmatprep.subr.mxu0 %v37_v0  ;;  %v34_v3 = vld [vmem:[%s478_s1 + $0x60] sm:$0xff]  ;;  %v33_v5 = vld [vmem:[%s478_s1 + $0x58] sm:$0xff]  ;;  %v136_v7 = vld [vmem:[%s480_s3 + $0x70] sm:$0xff] }
   0x3   :  { %265 = vmatpush3.msra.mxu0 %v37_v0  ;;  %v20_v4 = vld [vmem:[%s479_s0] sm:$0xff]  ;;  %v137_v6 = vld [vmem:[%s480_s3 + $0x78] sm:$0xff]  ;;  %v32_v8 = vld [vmem:[%s478_s1 + $0x50] sm:$0xff] }
   0x4   :  { %266 = vmatprep.subr.mxu0 %v36_v1  ;;  %296 = vmatprep.mubr.f32.mxu0 %v20_v4  ;;  %v135_v9 = vld [vmem:[%s480_s3 + $0x68] sm:$0xff]  ;;  %v134_v11 = vld [vmem:[%s480_s3 + $0x60] sm:$0xff]  ;;  %v133_v13 = vld [vmem:[%s480_s3 + $0x58] sm:$0xff] }
   0x5   :  { %267 = vmatpush3.msra.mxu0 %v36_v1  ;;  %299 = vmatprep.subr.mxu1 %v137_v6  ;;  %v31_v10 = vld [vmem:[%s478_s1 + $0x48] sm:$0xff]  ;;  %v30_v12 = vld [vmem:[%s478_s1 + $0x40] sm:$0xff]  ;;  %v29_v14 = vld [vmem:[%s478_s1 + $0x38] sm:$0xff] }
   0x6   :  { %268 = vmatprep.subr.mxu0 %v35_v2  ;;  %300 = vmatpush3.msra.mxu1 %v137_v6  ;;  %v132_v15 = vld [vmem:[%s480_s3 + $0x50] sm:$0xff]  ;;  %v131_v17 = vld [vmem:[%s480_s3 + $0x48] sm:$0xff]  ;;  %v130_v19 = vld [vmem:[%s480_s3 + $0x40] sm:$0xff] }
   0x7   :  { %269 = vmatpush3.msra.mxu0 %v35_v2  ;;  %301 = vmatprep.subr.mxu1 %v136_v7  ;;  %v28_v16 = vld [vmem:[%s478_s1 + $0x30] sm:$0xff]  ;;  %v27_v18 = vld [vmem:[%s478_s1 + $0x28] sm:$0xff]  ;;  %v26_v20 = vld [vmem:[%s478_s1 + $0x20] sm:$0xff] }
   0x8   :  { %270 = vmatprep.subr.mxu0 %v34_v3  ;;  %302 = vmatpush3.msra.mxu1 %v136_v7  ;;  %v129_v21 = vld [vmem:[%s480_s3 + $0x38] sm:$0xff]  ;;  %v128_v23 = vld [vmem:[%s480_s3 + $0x30] sm:$0xff]  ;;  %v127_v25 = vld [vmem:[%s480_s3 + $0x28] sm:$0xff] }
   0x9   :  { %271 = vmatpush3.msra.mxu0 %v34_v3  ;;  %303 = vmatprep.subr.mxu1 %v135_v9  ;;  %v25_v22 = vld [vmem:[%s478_s1 + $0x18] sm:$0xff]  ;;  %v24_v24 = vld [vmem:[%s478_s1 + $0x10] sm:$0xff]  ;;  %v23_v26 = vld [vmem:[%s478_s1 + $0x8] sm:$0xff] }
   0xa   :  { %272 = vmatprep.subr.mxu0 %v33_v5  ;;  %304 = vmatpush3.msra.mxu1 %v135_v9  ;;  %v126_v27 = vld [vmem:[%s480_s3 + $0x20] sm:$0xff]  ;;  %v21_v29 = vld [vmem:[%s479_s0 + $0x8] sm:$0xff]  ;;  %v125_v30 = vld [vmem:[%s480_s3 + $0x18] sm:$0xff] }
   0xb   :  { %273 = vmatpush3.msra.mxu0 %v33_v5  ;;  %305 = vmatprep.subr.mxu1 %v134_v11  ;;  %v22_v28 = vld [vmem:[%s478_s1] sm:$0xff]  ;;  %v124_v31 = vld [vmem:[%s480_s3 + $0x10] sm:$0xff]  ;;  %v123_v32 = vld [vmem:[%s480_s3 + $0x8] sm:$0xff] }
   0xc   :  { %274 = vmatprep.subr.mxu0 %v32_v8  ;;  %306 = vmatpush3.msra.mxu1 %v134_v11  ;;  %v122_v33 = vld [vmem:[%s480_s3] sm:$0xff] }
   0xd   :  { %275 = vmatpush3.msra.mxu0 %v32_v8  ;;  %307 = vmatprep.subr.mxu1 %v133_v13  ;;  %v226_v34 = vld [vmem:[%s481_s2] ss:$0 sm:$0xff] }
   0xe   :  { %276 = vmatprep.subr.mxu0 %v31_v10  ;;  %308 = vmatpush3.msra.mxu1 %v133_v13  ;;  %v227_v41 = vld [vmem:[%s482_s4] ss:$0 sm:$0xff] }
   0xf   :  { %277 = vmatpush3.msra.mxu0 %v31_v10  ;;  %309 = vmatprep.subr.mxu1 %v132_v15 }
  0x10   :  { %278 = vmatprep.subr.mxu0 %v30_v12  ;;  %310 = vmatpush3.msra.mxu1 %v132_v15 }
  0x11   :  { %279 = vmatpush3.msra.mxu0 %v30_v12  ;;  %311 = vmatprep.subr.mxu1 %v131_v17 }
  0x12   :  { %280 = vmatprep.subr.mxu0 %v29_v14  ;;  %312 = vmatpush3.msra.mxu1 %v131_v17 }
  0x13   :  { %281 = vmatpush3.msra.mxu0 %v29_v14  ;;  %313 = vmatprep.subr.mxu1 %v130_v19 }
  0x14   :  { %282 = vmatprep.subr.mxu0 %v28_v16  ;;  %314 = vmatpush3.msra.mxu1 %v130_v19 }
  0x15   :  { %283 = vmatpush3.msra.mxu0 %v28_v16  ;;  %315 = vmatprep.subr.mxu1 %v129_v21 }
  0x16   :  { %284 = vmatprep.subr.mxu0 %v27_v18  ;;  %316 = vmatpush3.msra.mxu1 %v129_v21 }
  0x17   :  { %285 = vmatpush3.msra.mxu0 %v27_v18  ;;  %317 = vmatprep.subr.mxu1 %v128_v23 }
  0x18   :  { %286 = vmatprep.subr.mxu0 %v26_v20  ;;  %318 = vmatpush3.msra.mxu1 %v128_v23 }
  0x19   :  { %287 = vmatpush3.msra.mxu0 %v26_v20  ;;  %319 = vmatprep.subr.mxu1 %v127_v25 }
  0x1a   :  { %288 = vmatprep.subr.mxu0 %v25_v22  ;;  %320 = vmatpush3.msra.mxu1 %v127_v25 }
  0x1b   :  { %289 = vmatpush3.msra.mxu0 %v25_v22  ;;  %321 = vmatprep.subr.mxu1 %v126_v27 }
  0x1c   :  { %290 = vmatprep.subr.mxu0 %v24_v24  ;;  %322 = vmatpush3.msra.mxu1 %v126_v27 }
  0x1d   :  { %291 = vmatpush3.msra.mxu0 %v24_v24  ;;  %323 = vmatprep.subr.mxu1 %v125_v30 }
  0x1e   :  { %292 = vmatprep.subr.mxu0 %v23_v26  ;;  %324 = vmatpush3.msra.mxu1 %v125_v30 }
  0x1f   :  { %293 = vmatpush3.msra.mxu0 %v23_v26  ;;  %325 = vmatprep.subr.mxu1 %v124_v31 }
  0x20   :  { %294 = vmatprep.subr.mxu0 %v22_v28  ;;  %326 = vmatpush3.msra.mxu1 %v124_v31 }
  0x21   :  { %295 = vmatpush3.msra.mxu0 %v22_v28  ;;  %327 = vmatprep.subr.mxu1 %v123_v32 }
  0x22   :  { %297 = vmatmul.mubr.f32.vlgmr.msra.gmra.mxu0 %v21_v29  ;;  %328 = vmatpush3.msra.mxu1 %v123_v32 }
  0x23   :  { %329 = vmatprep.subr.mxu1 %v122_v33 }
  0x24   :  { %330 = vmatpush3.msra.mxu1 %v122_v33 }
  0xe2   :  { %v298_v35 = vpop.f32.mrf.mxu0 }
  0xe3   :  { %v117_v36 = vadd.f32 %v298_v35, %v226_v34 }
  0xe4   :  { %v111_v37 = vpop.f32.mrf.mxu0 }
  0xe5   :  { %v112_v38 = vadd.f32 %v226_v34, %v111_v37  ;;  %v121_v40 = vmax.f32 %v117_v36, 0.0 }
  0xe7   :  { %v120_v39 = vmax.f32 %v112_v38, 0.0 }
  0xe9   :  { %331 = vmatprep.mubr.f32.mxu1 %v120_v39 }
  0xea   :  { %332 = vmatmul.mubr.f32.vlgmr.msra.gmra.mxu1 %v121_v40 }
 0x1aa   :  { %v333_v42 = vpop.f32.mrf.mxu1 }
 0x1ab   :  { %v217_v43 = vadd.f32 %v333_v42, %v227_v41 }
 0x1ac   :  { %v211_v44 = vpop.f32.mrf.mxu1 }
 0x1ad   :  { %221 = vst [vmem:[%s483_s5 + $0x8] sm:$0xff] %v217_v43  ;;  %v212_v45 = vadd.f32 %v227_v41, %v211_v44 }
 0x1af   :  { %220 = vst [vmem:[%s483_s5] sm:$0xff] %v212_v45 }

</bundles_post_ra>
